<compile_context>
chip_gen: v6e
topology: v6e:2x2x1
jax: 0.10.0
libtpu: 0.0.40
codegen_flags: <defaults>
</compile_context>

<pallas_src>
import jax
import jax.numpy as jnp
import numpy as np
from jax.experimental import pallas as pl
from jax.experimental.pallas import tpu as pltpu


def _round_up(x, m):
    return ((x + m - 1) // m) * m


# ---------------------------------------------------------------------------
# Pallas kernel: fused  relu(zc@W1_c + zp@W1_p + b1) @ W2 + b2  per edge tile.
# ---------------------------------------------------------------------------
def _edge_mlp_kernel(zc_ref, zp_ref, w1c_ref, w1p_ref, b1_ref, w2_ref, b2_ref,
                     o_ref):
    # lin1 over the two (un-concatenated) halves: bf16 operands, f32 acc.
    h = jnp.dot(zc_ref[...], w1c_ref[...], preferred_element_type=jnp.float32)
    h = h + jnp.dot(zp_ref[...], w1p_ref[...],
                    preferred_element_type=jnp.float32)
    h = jnp.maximum(h + b1_ref[...], 0.0)          # bias + ReLU in f32
    # lin2
    out = jnp.dot(h.astype(w2_ref.dtype), w2_ref[...],
                  preferred_element_type=jnp.float32)
    o_ref[...] = (out + b2_ref[...]).astype(o_ref.dtype)


# ---------------------------------------------------------------------------
# Wrapper: bf16 gather of endpoint embeddings, weight split/pad, fused kernel.
# ---------------------------------------------------------------------------
def edge_decoder_forward(params, z_customer, z_product, edge_label_index,
                         *, block_e=1024):
    hidden = z_customer.shape[1]
    assert z_product.shape[1] == hidden
    f_out = params["w2"].shape[1]

    row, col = edge_label_index
    num_edges = int(row.shape[0])
    if num_edges == 0:                       # guard: empty edge set
        return jnp.zeros((0, f_out), jnp.float32)

    # Edge tiling: big 16-aligned tiles, but keep >= 2 grid steps when E
    # allows it (v7x has 2 TensorCores; grid of 1 idles one of them).
    block_e = _round_up(max(block_e, 16), 16)
    half = _round_up(max(-(-num_edges // 2), 1), 16)
    te = max(16, min(block_e, half))
    e_pad = _round_up(num_edges, te)
    grid = e_pad // te

    # Gather: cast the small node tables to bf16 FIRST (halves gather bytes),
    # pad the int32 index vectors (not the [E,2H] feature matrix) to E_pad.
    row_p = jnp.pad(row.astype(jnp.int32), (0, e_pad - num_edges))
    col_p = jnp.pad(col.astype(jnp.int32), (0, e_pad - num_edges))
    zc = jnp.take(z_customer.astype(jnp.bfloat16), row_p, axis=0)  # [E_pad,H]
    zp = jnp.take(z_product.astype(jnp.bfloat16), col_p, axis=0)   # [E_pad,H]

    # Weights: split W1 across the two concat halves; pad only the tiny
    # hidden dim to 128 lanes. jnp.pad fills with exact zeros, so the padded
    # b1 entries are 0 and ReLU(0) * zero W2 rows keeps the math exact.
    hp = _round_up(hidden, 128)
    w1 = params["w1"]                                     # [2H, hidden]
    w1c = jnp.pad(w1[:hidden], ((0, 0), (0, hp - hidden))).astype(jnp.bfloat16)
    w1p = jnp.pad(w1[hidden:], ((0, 0), (0, hp - hidden))).astype(jnp.bfloat16)
    b1 = jnp.pad(params["b1"], (0, hp - hidden)).reshape(1, hp)        # f32
    w2 = jnp.pad(params["w2"], ((0, hp - hidden), (0, 0))).astype(jnp.bfloat16)
    b2 = params["b2"].reshape(1, f_out)                                # f32

    # Explicit VMEM budget with headroom (re-derived per tile; v7x = 64 MiB).
    vmem_need = (2 * 2 * te * hidden * 2          # zc+zp, double-buffered bf16
                 + 2 * te * f_out * 4             # output, double-buffered f32
                 + te * hp * 4                    # f32 intermediate h
                 + 2 * (2 * hidden * hp * 2       # W1_c + W1_p (x2 buffers)
                        + hp * 4 + hp * f_out * 2 + f_out * 4))
    vmem_limit = int(min(2 * vmem_need + 8 * 2 ** 20, 32 * 2 ** 20))

    # TODO(synk): for large `hidden` on v7x add pipeline_mode=pl.Buffered(1)
    # to the constant-index weight specs; at these sizes it saves <32 KiB.
    # TODO(synk): for very large E, fold the gather into the kernel via
    # PrefetchScalarGridSpec + batched row-group DMAs (not per-edge copies).
    out = pl.pallas_call(
        _edge_mlp_kernel,
        out_shape=jax.ShapeDtypeStruct((e_pad, f_out), jnp.float32),
        grid=(grid,),
        in_specs=[
            pl.BlockSpec((te, hidden), lambda i: (i, 0)),   # zc edge stream
            pl.BlockSpec((te, hidden), lambda i: (i, 0)),   # zp edge stream
            pl.BlockSpec((hidden, hp), lambda i: (0, 0)),   # W1 (customer half)
            pl.BlockSpec((hidden, hp), lambda i: (0, 0)),   # W1 (product half)
            pl.BlockSpec((1, hp), lambda i: (0, 0)),        # b1
            pl.BlockSpec((hp, f_out), lambda i: (0, 0)),    # W2
            pl.BlockSpec((1, f_out), lambda i: (0, 0)),     # b2
        ],
        out_specs=pl.BlockSpec((te, f_out), lambda i: (i, 0)),
        compiler_params=pltpu.CompilerParams(
            dimension_semantics=("parallel",),
            vmem_limit_bytes=vmem_limit),
    )(zc, zp, w1c, w1p, b1, w2, b2)

    return out[:num_edges]


# ---------------------------------------------------------------------------
# Pure-JAX reference (mirrors the PyTorch module, f32 end to end).
# ---------------------------------------------------------------------------
def edge_decoder_reference(params, z_customer, z_product, edge_label_index):
    row, col = edge_label_index
    z = jnp.concatenate([z_customer[row], z_product[col]], axis=-1)
    h = jnp.maximum(z @ params["w1"] + params["b1"], 0.0)
    return h @ params["w2"] + params["b2"]


def init_params(key, hidden_channels, edge_features):
    k1, k2, k3, k4 = jax.random.split(key, 4)
    s1 = 1.0 / jnp.sqrt(2 * hidden_channels)
    s2 = 1.0 / jnp.sqrt(hidden_channels)
    return {
        # stored [in, out] (math orientation); equivalent to torch Linear.
        "w1": jax.random.uniform(k1, (2 * hidden_channels, hidden_channels),
                                 jnp.float32, -s1, s1),
        "b1": jax.random.uniform(k2, (hidden_channels,), jnp.float32, -s1, s1),
        "w2": jax.random.uniform(k3, (hidden_channels, edge_features),
                                 jnp.float32, -s2, s2),
        "b2": jax.random.uniform(k4, (edge_features,), jnp.float32, -s2, s2),
    }


if __name__ == "__main__":
    hidden_channels = 32
    edge_features = 8
    num_customers = 12
    num_products = 10
    num_edges = 8

    key = jax.random.PRNGKey(0)
    kc, kpr, ke1, ke2, kw = jax.random.split(key, 5)

    z_customer = jax.random.normal(kc, (num_customers, hidden_channels),
                                   dtype=jnp.float32)
    z_product = jax.random.normal(kpr, (num_products, hidden_channels),
                                  dtype=jnp.float32)
    row = jax.random.randint(ke1, (num_edges,), 0, num_customers, jnp.int32)
    col = jax.random.randint(ke2, (num_edges,), 0, num_products, jnp.int32)
    edge_label_index = (row, col)

    params = init_params(kw, hidden_channels, edge_features)

    out = edge_decoder_forward(params, z_customer, z_product, edge_label_index)
    out = jax.block_until_ready(out)
    assert out.shape == (num_edges, edge_features)

    ref = edge_decoder_reference(params, z_customer, z_product,
                                 edge_label_index)
    # bf16 operands (f32 accumulation) vs the f32 PyTorch module: loosened
    # tolerance is a deliberate precision/bandwidth trade-off.
    np.testing.assert_allclose(np.asarray(out), np.asarray(ref),
                               rtol=1e-1, atol=1e-1)
    print("KERNEL_OK")
</pallas_src>

<mosaic_0001>
module attributes {stable_mosaic.version = 11 : i64} {
  func.func @_edge_mlp_kernel(%arg0: i32, %arg1: memref<16x32xbf16, #tpu.memory_space<vmem>>, %arg2: memref<16x32xbf16, #tpu.memory_space<vmem>>, %arg3: memref<32x128xbf16, #tpu.memory_space<vmem>>, %arg4: memref<32x128xbf16, #tpu.memory_space<vmem>>, %arg5: memref<1x128xf32, #tpu.memory_space<vmem>>, %arg6: memref<128x8xbf16, #tpu.memory_space<vmem>>, %arg7: memref<1x8xf32, #tpu.memory_space<vmem>>, %arg8: memref<16x8xf32, #tpu.memory_space<vmem>>) attributes {dimension_semantics = [#tpu.dimension_semantics<parallel>], iteration_bounds = array<i64: 1>, scalar_prefetch = 0 : i64, scratch_operands = 0 : i64, tpu.core_type = #tpu.core_type<tc>, window_params = [{transform_indices = @transform_0, window_bounds = array<i64: 16, 32>}, {transform_indices = @transform_1, window_bounds = array<i64: 16, 32>}, {pipeline_mode = #tpu.pipeline_mode<synchronous>, transform_indices = @transform_2, window_bounds = array<i64: 32, 128>}, {pipeline_mode = #tpu.pipeline_mode<synchronous>, transform_indices = @transform_3, window_bounds = array<i64: 32, 128>}, {pipeline_mode = #tpu.pipeline_mode<synchronous>, transform_indices = @transform_4, window_bounds = array<i64: 1, 128>}, {pipeline_mode = #tpu.pipeline_mode<synchronous>, transform_indices = @transform_5, window_bounds = array<i64: 128, 8>}, {pipeline_mode = #tpu.pipeline_mode<synchronous>, transform_indices = @transform_6, window_bounds = array<i64: 1, 8>}, {transform_indices = @transform_7, window_bounds = array<i64: 16, 8>}]} {
    %c0 = arith.constant 0 : index
    %c0_0 = arith.constant 0 : index
    %0 = vector.load %arg1[%c0, %c0_0] : memref<16x32xbf16, #tpu.memory_space<vmem>>, vector<16x32xbf16>
    %c0_1 = arith.constant 0 : index
    %c0_2 = arith.constant 0 : index
    %1 = vector.load %arg3[%c0_1, %c0_2] : memref<32x128xbf16, #tpu.memory_space<vmem>>, vector<32x128xbf16>
    %cst = arith.constant dense<0.000000e+00> : vector<16x128xf32>
    %2 = tpu.matmul %0, %1, %cst {dimension_numbers = #tpu.dot_dimension_numbers<[1], [0], [0], [1], [0, 0, 1, 1], [], []>} : vector<16x32xbf16>, vector<32x128xbf16>, vector<16x128xf32> -> vector<16x128xf32>
    %c0_3 = arith.constant 0 : index
    %c0_4 = arith.constant 0 : index
    %3 = vector.load %arg2[%c0_3, %c0_4] : memref<16x32xbf16, #tpu.memory_space<vmem>>, vector<16x32xbf16>
    %c0_5 = arith.constant 0 : index
    %c0_6 = arith.constant 0 : index
    %4 = vector.load %arg4[%c0_5, %c0_6] : memref<32x128xbf16, #tpu.memory_space<vmem>>, vector<32x128xbf16>
    %cst_7 = arith.constant dense<0.000000e+00> : vector<16x128xf32>
    %5 = tpu.matmul %3, %4, %cst_7 {dimension_numbers = #tpu.dot_dimension_numbers<[1], [0], [0], [1], [0, 0, 1, 1], [], []>} : vector<16x32xbf16>, vector<32x128xbf16>, vector<16x128xf32> -> vector<16x128xf32>
    %6 = arith.addf %2, %5 : vector<16x128xf32>
    %c0_8 = arith.constant 0 : index
    %c0_9 = arith.constant 0 : index
    %7 = vector.load %arg5[%c0_8, %c0_9] : memref<1x128xf32, #tpu.memory_space<vmem>>, vector<1x128xf32>
    %8 = vector.broadcast %7 : vector<1x128xf32> to vector<16x128xf32>
    %9 = arith.addf %6, %8 : vector<16x128xf32>
    %cst_10 = arith.constant 0.000000e+00 : f32
    %10 = vector.broadcast %cst_10 : f32 to vector<16x128xf32>
    %11 = arith.maximumf %9, %10 : vector<16x128xf32>
    %12 = arith.truncf %11 : vector<16x128xf32> to vector<16x128xbf16>
    %c0_11 = arith.constant 0 : index
    %c0_12 = arith.constant 0 : index
    %13 = vector.load %arg6[%c0_11, %c0_12] : memref<128x8xbf16, #tpu.memory_space<vmem>>, vector<128x8xbf16>
    %cst_13 = arith.constant dense<0.000000e+00> : vector<16x8xf32>
    %14 = tpu.matmul %12, %13, %cst_13 {dimension_numbers = #tpu.dot_dimension_numbers<[1], [0], [0], [1], [0, 0, 1, 1], [], []>} : vector<16x128xbf16>, vector<128x8xbf16>, vector<16x8xf32> -> vector<16x8xf32>
    %c0_14 = arith.constant 0 : index
    %c0_15 = arith.constant 0 : index
    %15 = vector.load %arg7[%c0_14, %c0_15] : memref<1x8xf32, #tpu.memory_space<vmem>>, vector<1x8xf32>
    %16 = vector.broadcast %15 : vector<1x8xf32> to vector<16x8xf32>
    %17 = arith.addf %14, %16 : vector<16x8xf32>
    %c0_16 = arith.constant 0 : index
    %c0_17 = arith.constant 0 : index
    %18 = vector.load %arg8[%c0_16, %c0_17] : memref<16x8xf32, #tpu.memory_space<vmem>>, vector<16x8xf32>
    tpu.vector_store %arg8[%c0_16, %c0_17], %17 {strides = array<i32>} : memref<16x8xf32, #tpu.memory_space<vmem>>, vector<16x8xf32>,
    return
  }
  func.func @transform_0(%arg0: i32) -> (i32, i32) {
    %c0_i32 = arith.constant 0 : i32
    %c0_i32_0 = arith.constant 0 : i32
    return %arg0, %c0_i32 : i32, i32
  }
  func.func @transform_1(%arg0: i32) -> (i32, i32) {
    %c0_i32 = arith.constant 0 : i32
    %c0_i32_0 = arith.constant 0 : i32
    return %arg0, %c0_i32 : i32, i32
  }
  func.func @transform_2(%arg0: i32) -> (i32, i32) {
    %c0_i32 = arith.constant 0 : i32
    %c0_i32_0 = arith.constant 0 : i32
    %c0_i32_1 = arith.constant 0 : i32
    return %c0_i32, %c0_i32_0 : i32, i32
  }
  func.func @transform_3(%arg0: i32) -> (i32, i32) {
    %c0_i32 = arith.constant 0 : i32
    %c0_i32_0 = arith.constant 0 : i32
    %c0_i32_1 = arith.constant 0 : i32
    return %c0_i32, %c0_i32_0 : i32, i32
  }
  func.func @transform_4(%arg0: i32) -> (i32, i32) {
    %c0_i32 = arith.constant 0 : i32
    %c0_i32_0 = arith.constant 0 : i32
    %c0_i32_1 = arith.constant 0 : i32
    return %c0_i32, %c0_i32_0 : i32, i32
  }
  func.func @transform_5(%arg0: i32) -> (i32, i32) {
    %c0_i32 = arith.constant 0 : i32
    %c0_i32_0 = arith.constant 0 : i32
    %c0_i32_1 = arith.constant 0 : i32
    return %c0_i32, %c0_i32_0 : i32, i32
  }
  func.func @transform_6(%arg0: i32) -> (i32, i32) {
    %c0_i32 = arith.constant 0 : i32
    %c0_i32_0 = arith.constant 0 : i32
    %c0_i32_1 = arith.constant 0 : i32
    return %c0_i32, %c0_i32_0 : i32, i32
  }
  func.func @transform_7(%arg0: i32) -> (i32, i32) {
    %c0_i32 = arith.constant 0 : i32
    %c0_i32_0 = arith.constant 0 : i32
    return %arg0, %c0_i32 : i32, i32
  }
}

</mosaic_0001>

<bundles_post_ra>
// kernel: tpu_custom_call.1
= control target key start
LH: loop header
LB: loop body
LE: loop exit
PB: predicated region body
PF: predicated region fallthrough
CT: control target
= control target key end

     0   :  { %v378_v0 = vmov 0.0   ;;  %vm379_vm0 = vmmov 0   ;;  %vm56_vm1 = vcmask 261120   ;;  %vm286_vm2 = vcmask 64512   ;;  %s479_s3 = inlined_call_operand.vmem [shape: bf16[32,128], index: 3, kind: input, shape index: {}]   ;;  %s480_s1 = inlined_call_operand.vmem [shape: bf16[16,32], index: 1, kind: input, shape index: {}]   ;;  %s481_s2 = inlined_call_operand.vmem [shape: bf16[32,128], index: 2, kind: input, shape index: {}]   ;;  %s482_s5 = inlined_call_operand.vmem [shape: bf16[128,8], index: 5, kind: input, shape index: {}]   ;;  %s483_s0 = inlined_call_operand.vmem [shape: bf16[16,32], index: 0, kind: input, shape index: {}]   ;;  %s484_s4 = inlined_call_operand.vmem [shape: f32[1,128], index: 4, kind: input, shape index: {}]   ;;  %s485_s6 = inlined_call_operand.vmem [shape: f32[1,8], index: 6, kind: input, shape index: {}]   ;;  %s486_s7 = inlined_call_operand.vmem [shape: f32[16,8], index: 7, kind: output, shape index: {}]  }
   0x1   :  { %326 = vmatprep.subr.bf16.mxu1 %v378_v0  ;;  %v364_v1 = vld [vmem:[%s479_s3 + $0x8] sm:$0xff]   ;;  %330 = vmatprep.mubr.msk.bf16.mxu1 %vm379_vm0, %v378_v0  ;;  %v365_v2 = vld [vmem:[%s479_s3] sm:$0xff]   ;;  %v370_v5 = vld [vmem:[%s482_s5 + $0x38] sm:$0xff]  }
   0x2   :  { %342 = vmatprep.subr.bf16.mxu0 %v378_v0  ;;  %358 = vmatprep.mubr.msk.bf16.mxu0 %vm379_vm0, %v378_v0  ;;  %v366_v3 = vld [vmem:[%s480_s1] sm:$0xff]   ;;  %v367_v4 = vld [vmem:[%s481_s2 + $0x8] sm:$0xff]   ;;  %v371_v7 = vld [vmem:[%s482_s5 + $0x30] sm:$0xff]  }
   0x3   :  { %327 = vmatpush3.bf16.msra.mxu1 %v364_v1  ;;  %v368_v6 = vld [vmem:[%s481_s2] sm:$0xff]   ;;  %343 = vmatpush3.bf16.msra.mxu0 %v370_v5  ;;  %v372_v8 = vld [vmem:[%s482_s5 + $0x28] sm:$0xff]   ;;  %v374_v11 = vld [vmem:[%s482_s5 + $0x18] sm:$0xff]  }
   0x4   :  { %328 = vmatprep.subr.bf16.mxu1 %v378_v0  ;;  %344 = vmatprep.subr.bf16.mxu0 %v378_v0  ;;  %v369_v9 = vld [vmem:[%s483_s0] sm:$0xff]   ;;  %v375_v12 = vld [vmem:[%s482_s5 + $0x10] sm:$0xff]   ;;  %v376_v13 = vld [vmem:[%s482_s5 + $0x8] sm:$0xff]  }
   0x5   :  { %v373_v10 = vld [vmem:[%s482_s5 + $0x20] sm:$0xff]  }
   0x6   :  { %v377_v14 = vld [vmem:[%s482_s5] sm:$0xff]  }
   0x7   :  { %329 = vmatpush3.bf16.msra.mxu1 %v365_v2  ;;  %345 = vmatpush3.bf16.msra.mxu0 %v371_v7  ;;  %v301_v21 = vld [vmem:[%s484_s4] ss:$0 sm:$0xff] }
   0x8   :  { %334 = vmatprep.subr.bf16.mxu1 %v378_v0  ;;  %346 = vmatprep.subr.bf16.mxu0 %v378_v0  ;;  %v302_v31 = vld [vmem:[%s485_s6] ss:$0 sm:$0xff] }
   0xa   :  { %331 = vmatmul.mubr.msk.bf16.vlgmr.msra.gmra.mxu1 %vm56_vm1, %v366_v3 }
   0xb   :  { %335 = vmatpush3.bf16.msra.mxu1 %v367_v4  ;;  %338 = vmatprep.mubr.msk.bf16.mxu1 %vm379_vm0, %v378_v0 }
   0xc   :  { %336 = vmatprep.subr.bf16.mxu1 %v378_v0  ;;  %347 = vmatpush3.bf16.msra.mxu0 %v372_v8 }
   0xd   :  { %348 = vmatprep.subr.bf16.mxu0 %v378_v0 }
   0xf   :  { %337 = vmatpush3.bf16.msra.mxu1 %v368_v6 }
  0x10   :  { %349 = vmatpush3.bf16.msra.mxu0 %v373_v10 }
  0x11   :  { %350 = vmatprep.subr.bf16.mxu0 %v378_v0 }
  0x12   :  { %339 = vmatmul.mubr.msk.bf16.vlgmr.msra.gmra.mxu1 %vm56_vm1, %v369_v9 }
  0x14   :  { %351 = vmatpush3.bf16.msra.mxu0 %v374_v11 }
  0x15   :  { %352 = vmatprep.subr.bf16.mxu0 %v378_v0 }
  0x18   :  { %353 = vmatpush3.bf16.msra.mxu0 %v375_v12 }
  0x19   :  { %354 = vmatprep.subr.bf16.mxu0 %v378_v0 }
  0x1c   :  { %355 = vmatpush3.bf16.msra.mxu0 %v376_v13 }
  0x1d   :  { %356 = vmatprep.subr.bf16.mxu0 %v378_v0 }
  0x20   :  { %357 = vmatpush3.bf16.msra.mxu0 %v377_v14 }
  0xca   :  { %v94_v15 = vpop.f32.mrf.mxu1 }
  0xcc   :  { %v332_v16 = vpop.f32.mrf.mxu1 }
  0xce   :  { %v97_v17 = vpop.f32.mrf.mxu1 }
  0xd0   :  { %v333_v18 = vpop.f32.mrf.mxu1 }
  0xd2   :  { %v155_v19 = vpop.f32.mrf.mxu1 }
  0xd3   :  { %v156_v20 = vadd.f32 %v155_v19, %v94_v15 }
  0xd4   :  { %v340_v22 = vpop.f32.mrf.mxu1 }
  0xd5   :  { %v169_v24 = vadd.f32 %v301_v21, %v156_v20 }
  0xd6   :  { %v158_v23 = vpop.f32.mrf.mxu1 }
  0xd7   :  { %v159_v25 = vadd.f32 %v158_v23, %v97_v17  ;;  %v171_v28 = vmax.f32 %v169_v24, 0.0 }
  0xd8   :  { %v341_v26 = vpop.f32.mrf.mxu1 }
  0xd9   :  { %v170_v27 = vadd.f32 %v301_v21, %v159_v25 }
  0xdb   :  { %v172_v29 = vmax.f32 %v170_v27, 0.0 }
  0xdd   :  { %v173_v30 = vpack.c.bf16 %v172_v29, %v171_v28 }
  0xdf   :  { %359 = vmatmul.mubr.bf16.vlgmr.msra.gmra.mxu0 %v173_v30 }
 0x19f   :  { %v279_v32 = vpop.f32.mrf.mxu0 }
 0x1a0   :  { %v280_v33 = vadd.f32 %v302_v31, %v279_v32 }
 0x1a1   :  { %v360_v34 = vpop.f32.mrf.mxu0 }
 0x1a2   :  { %287 = vst.msk [vmem:[%s486_s7] sm:$0xff] %vm286_vm2, %v280_v33 }
 0x1a3   :  { %v282_v35 = vpop.f32.mrf.mxu0 }
 0x1a4   :  { %v283_v36 = vadd.f32 %v302_v31, %v282_v35 }
 0x1a5   :  { %v361_v37 = vpop.f32.mrf.mxu0 }
 0x1a6   :  { %288 = vst.msk [vmem:[%s486_s7 + $0x8] sm:$0xff] %vm286_vm2, %v283_v36 }

</bundles_post_ra>
